<compile_context>
chip_gen: v6e
topology: v6e:2x2x1
jax: 0.10.0
libtpu: 0.0.40
codegen_flags: <defaults>
</compile_context>

<pallas_src>
import functools
import math

import jax
import jax.numpy as jnp
from jax.experimental import pallas as pl
from jax.experimental.pallas import tpu as pltpu


def _mix32(x):
    """murmur3-style 32-bit finalizer: good avalanche, pure VPU int ops."""
    x = x ^ (x >> 16)
    x = x * jnp.uint32(0x7FEB352D)
    x = x ^ (x >> 15)
    x = x * jnp.uint32(0x846CA68B)
    x = x ^ (x >> 16)
    return x


def _pe_dropout_kernel(seed_ref, x_ref, pe_ref, o_ref, *,
                       keep_threshold, scale, apply_dropout, tile_elems):
    # x_ref : (tile_s, B, D) VMEM tile
    # pe_ref: (tile_s, 1, D) VMEM tile (broadcasts over batch in-VMEM)
    # seed  : (1,) int32, scalar-prefetched into SMEM
    y = x_ref[...] + pe_ref[...]

    if not apply_dropout:
        o_ref[...] = y.astype(o_ref.dtype)
        return

    # Counter-based stateless RNG: hash(global element index, seed).
    # Each grid tile gets a disjoint counter range via program_id, so the
    # dropout mask is NOT replayed across tiles.
    # TODO(synk): cannot bit-match torch's RNG stream for nn.Dropout.
    shape = y.shape
    s_idx = jax.lax.broadcasted_iota(jnp.int32, shape, 0)
    b_idx = jax.lax.broadcasted_iota(jnp.int32, shape, 1)
    d_idx = jax.lax.broadcasted_iota(jnp.int32, shape, 2)
    flat = (s_idx * (shape[1] * shape[2]) + b_idx * shape[2] + d_idx).astype(jnp.uint32)
    tile_off = (pl.program_id(0) * tile_elems).astype(jnp.uint32)
    key = seed_ref[0].astype(jnp.uint32) * jnp.uint32(0x9E3779B9)
    bits = _mix32((flat + tile_off) ^ key)

    keep = bits < jnp.uint32(keep_threshold)          # P(keep) = 1 - p
    o_ref[...] = jnp.where(keep, y * scale, jnp.zeros_like(y)).astype(o_ref.dtype)


def make_positional_encoding(d_model: int, max_len: int = 7) -> jnp.ndarray:
    """Deterministic sinusoidal PE table, identical to the PyTorch __init__."""
    position = jnp.arange(max_len, dtype=jnp.float32)[:, None]          # (max_len, 1)
    div_term = jnp.exp(
        jnp.arange(0, d_model, 2, dtype=jnp.float32) * (-(math.log(10000.0) / d_model))
    )                                                                    # (d_model/2,)
    pe = jnp.zeros((max_len, 1, d_model), dtype=jnp.float32)
    pe = pe.at[:, 0, 0::2].set(jnp.sin(position * div_term))
    pe = pe.at[:, 0, 1::2].set(jnp.cos(position * div_term))
    return pe                                                            # (max_len, 1, d_model)


def positional_encoding_forward(x: jnp.ndarray, pe: jnp.ndarray, seed: int, *,
                                p: float = 0.1, training: bool = True,
                                tile_bytes: int = 4 << 20,
                                tile_s: int | None = None) -> jnp.ndarray:
    """x: (S, B, D); pe: (max_len, 1, D); returns dropout(x + pe[:S]) (or x+pe in eval)."""
    S, B, D = x.shape
    pe_s = pe[:S].astype(x.dtype)                    # (S, 1, D)

    # Tile over the sequence axis; ~tile_bytes per x tile keeps the
    # double-buffered footprint (2x in + 2x out + 2x pe) well under the 32 MiB
    # scoped-VMEM limit on every generation, while making grid steps large
    # enough that the per-step overhead (~0.35 us) is amortized away.
    if tile_s is None:
        row_bytes = B * D * x.dtype.itemsize
        tile_s = max(1, min(S, tile_bytes // max(1, row_bytes)))
        if tile_s >= 8:
            tile_s = (tile_s // 8) * 8               # sublane-friendly leading dim
    tile_s = max(1, min(tile_s, S))
    grid_s = pl.cdiv(S, tile_s)                      # ragged last tile masked by Pallas
                                                     # (no wrapper-side jnp.pad copy)

    apply_dropout = training and p > 0.0
    keep_threshold = min(int(round((1.0 - p) * (2.0 ** 32))), 2 ** 32 - 1)
    scale = (1.0 / (1.0 - p)) if apply_dropout else 1.0

    kernel = functools.partial(
        _pe_dropout_kernel,
        keep_threshold=keep_threshold, scale=scale,
        apply_dropout=apply_dropout, tile_elems=tile_s * B * D)

    seed_arr = jnp.asarray([seed], dtype=jnp.int32)

    n = S * B * D
    itemsize = x.dtype.itemsize
    cost = pl.CostEstimate(
        flops=3 * n,                                  # add + mask-select + scale
        transcendentals=0,
        bytes_accessed=(2 * n + S * D) * itemsize)    # read x, write out, read pe

    out = pl.pallas_call(
        kernel,
        out_shape=jax.ShapeDtypeStruct((S, B, D), x.dtype),
        grid_spec=pltpu.PrefetchScalarGridSpec(
            num_scalar_prefetch=1,                    # seed -> SMEM
            grid=(grid_s,),
            in_specs=[
                pl.BlockSpec((tile_s, B, D), lambda i, sref: (i, 0, 0)),   # x
                pl.BlockSpec((tile_s, 1, D), lambda i, sref: (i, 0, 0)),   # pe
            ],
            out_specs=pl.BlockSpec((tile_s, B, D), lambda i, sref: (i, 0, 0)),
        ),
        compiler_params=pltpu.CompilerParams(
            dimension_semantics=("parallel",),        # shard grid across TCs on v7x
            vmem_limit_bytes=32 * 1024 * 1024,
        ),
        cost_estimate=cost,
    )(seed_arr, x, pe_s)

    return out


if __name__ == "__main__":
    # Small shapes consistent with the module: max_len=7 caps the sequence length.
    SEQ, BATCH, D_MODEL = 7, 2, 32
    P = 0.1

    key = jax.random.PRNGKey(0)
    x = jax.random.normal(key, (SEQ, BATCH, D_MODEL), dtype=jnp.float32)
    pe = make_positional_encoding(D_MODEL, max_len=7)

    out = jax.block_until_ready(
        positional_encoding_forward(x, pe, seed=0, p=P, training=True))
    assert out.shape == x.shape and out.dtype == x.dtype

    # Surviving elements equal (x + pe) / (1 - p); dropped elements are exactly 0.
    ref = (x + pe[:SEQ]) * (1.0 / (1.0 - P))
    kept = out != 0.0
    assert bool(jnp.all(jnp.where(kept, jnp.abs(out - ref) < 1e-4, True)))
    drop_frac = 1.0 - float(jnp.mean(kept.astype(jnp.float32)))
    assert 0.0 <= drop_frac <= 0.5

    # Eval path reduces to exact x + pe.
    out_eval = jax.block_until_ready(
        positional_encoding_forward(x, pe, seed=0, p=P, training=False))
    assert bool(jnp.all(jnp.abs(out_eval - (x + pe[:SEQ])) < 1e-5))

    # Exercise the ragged last-tile path (S=7 with tile_s=4 -> grid of 2,
    # second block partially out of bounds, handled by Pallas masking).
    out_ragged = jax.block_until_ready(
        positional_encoding_forward(x, pe, seed=0, p=P, training=False, tile_s=4))
    assert bool(jnp.all(jnp.abs(out_ragged - (x + pe[:SEQ])) < 1e-5))

    print("KERNEL_OK")
</pallas_src>

<mosaic_0001>
module attributes {stable_mosaic.version = 11 : i64} {
  func.func @_pe_dropout_kernel(%arg0: i32, %arg1: memref<1xi32, #tpu.memory_space<smem>>, %arg2: memref<7x2x32xf32, #tpu.memory_space<vmem>>, %arg3: memref<7x1x32xf32, #tpu.memory_space<vmem>>, %arg4: memref<7x2x32xf32, #tpu.memory_space<vmem>>) attributes {dimension_semantics = [#tpu.dimension_semantics<parallel>], iteration_bounds = array<i64: 1>, scalar_prefetch = 1 : i64, scratch_operands = 0 : i64, tpu.core_type = #tpu.core_type<tc>, window_params = [{transform_indices = @transform_0, window_bounds = array<i64: 7, 2, 32>}, {transform_indices = @transform_1, window_bounds = array<i64: 7, 1, 32>}, {transform_indices = @transform_2, window_bounds = array<i64: 7, 2, 32>}]} {
    %c0 = arith.constant 0 : index
    %c0_0 = arith.constant 0 : index
    %c0_1 = arith.constant 0 : index
    %0 = vector.load %arg2[%c0, %c0_0, %c0_1] : memref<7x2x32xf32, #tpu.memory_space<vmem>>, vector<7x2x32xf32>
    %c0_2 = arith.constant 0 : index
    %c0_3 = arith.constant 0 : index
    %c0_4 = arith.constant 0 : index
    %1 = vector.load %arg3[%c0_2, %c0_3, %c0_4] : memref<7x1x32xf32, #tpu.memory_space<vmem>>, vector<7x1x32xf32>
    %2 = vector.broadcast %1 : vector<7x1x32xf32> to vector<7x2x32xf32>
    %3 = arith.addf %0, %2 : vector<7x2x32xf32>
    %4 = tpu.iota {dimensions = array<i32: 0>} : vector<7x2x32xi32>
    %5 = tpu.iota {dimensions = array<i32: 1>} : vector<7x2x32xi32>
    %6 = tpu.iota {dimensions = array<i32: 2>} : vector<7x2x32xi32>
    %c64_i32 = arith.constant 64 : i32
    %7 = vector.broadcast %c64_i32 : i32 to vector<7x2x32xi32>
    %8 = arith.muli %4, %7 : vector<7x2x32xi32>
    %c32_i32 = arith.constant 32 : i32
    %9 = vector.broadcast %c32_i32 : i32 to vector<7x2x32xi32>
    %10 = arith.muli %5, %9 : vector<7x2x32xi32>
    %11 = arith.addi %8, %10 : vector<7x2x32xi32>
    %12 = arith.addi %11, %6 : vector<7x2x32xi32>
    %c448_i32 = arith.constant 448 : i32
    %13 = arith.muli %arg0, %c448_i32 : i32
    %c0_5 = arith.constant 0 : index
    %14 = memref.load %arg1[%c0_5] : memref<1xi32, #tpu.memory_space<smem>>
    %c-1640531527_i32 = arith.constant -1640531527 : i32
    %15 = arith.muli %14, %c-1640531527_i32 : i32
    %16 = vector.broadcast %13 : i32 to vector<7x2x32xi32>
    %17 = arith.addi %12, %16 : vector<7x2x32xi32>
    %18 = vector.broadcast %15 : i32 to vector<7x2x32xi32>
    %19 = arith.xori %17, %18 : vector<7x2x32xi32>
    %c16_i32 = arith.constant 16 : i32
    %20 = vector.broadcast %c16_i32 : i32 to vector<7x2x32xi32>
    %21 = arith.shrui %19, %20 : vector<7x2x32xi32>
    %22 = arith.xori %19, %21 : vector<7x2x32xi32>
    %c2146121005_i32 = arith.constant 2146121005 : i32
    %23 = vector.broadcast %c2146121005_i32 : i32 to vector<7x2x32xi32>
    %24 = arith.muli %22, %23 : vector<7x2x32xi32>
    %c15_i32 = arith.constant 15 : i32
    %25 = vector.broadcast %c15_i32 : i32 to vector<7x2x32xi32>
    %26 = arith.shrui %24, %25 : vector<7x2x32xi32>
    %27 = arith.xori %24, %26 : vector<7x2x32xi32>
    %c-2073254261_i32 = arith.constant -2073254261 : i32
    %28 = vector.broadcast %c-2073254261_i32 : i32 to vector<7x2x32xi32>
    %29 = arith.muli %27, %28 : vector<7x2x32xi32>
    %c16_i32_6 = arith.constant 16 : i32
    %30 = vector.broadcast %c16_i32_6 : i32 to vector<7x2x32xi32>
    %31 = arith.shrui %29, %30 : vector<7x2x32xi32>
    %32 = arith.xori %29, %31 : vector<7x2x32xi32>
    %c-429496730_i32 = arith.constant -429496730 : i32
    %33 = vector.broadcast %c-429496730_i32 : i32 to vector<7x2x32xi32>
    %34 = arith.cmpi ult, %32, %33 : vector<7x2x32xi32>
    %cst = arith.constant 1.11111116 : f32
    %35 = vector.broadcast %cst : f32 to vector<7x2x32xf32>
    %36 = arith.mulf %3, %35 : vector<7x2x32xf32>
    %cst_7 = arith.constant 0.000000e+00 : f32
    %37 = vector.broadcast %cst_7 : f32 to vector<7x2x32xf32>
    %38 = arith.select %34, %36, %37 : vector<7x2x32xi1>, vector<7x2x32xf32>
    %c0_8 = arith.constant 0 : index
    %c0_9 = arith.constant 0 : index
    %c0_10 = arith.constant 0 : index
    %39 = vector.load %arg4[%c0_8, %c0_9, %c0_10] : memref<7x2x32xf32, #tpu.memory_space<vmem>>, vector<7x2x32xf32>
    tpu.vector_store %arg4[%c0_8, %c0_9, %c0_10], %38 {strides = array<i32>} : memref<7x2x32xf32, #tpu.memory_space<vmem>>, vector<7x2x32xf32>,
    return
  }
  func.func @transform_0(%arg0: i32, %arg1: memref<1xi32, #tpu.memory_space<smem>>) -> (i32, i32, i32) {
    %c0_i32 = arith.constant 0 : i32
    %c0_i32_0 = arith.constant 0 : i32
    %c0_i32_1 = arith.constant 0 : i32
    return %arg0, %c0_i32, %c0_i32_0 : i32, i32, i32
  }
  func.func @transform_1(%arg0: i32, %arg1: memref<1xi32, #tpu.memory_space<smem>>) -> (i32, i32, i32) {
    %c0_i32 = arith.constant 0 : i32
    %c0_i32_0 = arith.constant 0 : i32
    %c0_i32_1 = arith.constant 0 : i32
    return %arg0, %c0_i32, %c0_i32_0 : i32, i32, i32
  }
  func.func @transform_2(%arg0: i32, %arg1: memref<1xi32, #tpu.memory_space<smem>>) -> (i32, i32, i32) {
    %c0_i32 = arith.constant 0 : i32
    %c0_i32_0 = arith.constant 0 : i32
    %c0_i32_1 = arith.constant 0 : i32
    return %arg0, %c0_i32, %c0_i32_0 : i32, i32, i32
  }
}

</mosaic_0001>

<bundles_post_ra>
// kernel: tpu_custom_call.1
= control target key start
LH: loop header
LB: loop body
LE: loop exit
PB: predicated region body
PF: predicated region fallthrough
CT: control target
= control target key end

     0   :  { %9 = vsyncpa [#allocation5], 0  ;;  %s377_s0 = inlined_call_operand.<no memory space> [shape: s32[1], index: 0, kind: input, shape index: {}]   ;;  %s378_s1 = inlined_call_operand.hbm [shape: f32[7,2,32], index: 1, kind: input, shape index: {}]   ;;  %s379_s2 = inlined_call_operand.hbm [shape: f32[7,1,32], index: 2, kind: input, shape index: {}]   ;;  %s380_s3 = inlined_call_operand.hbm [shape: f32[7,2,32], index: 3, kind: output, shape index: {}]  }
   0x1   :  { %10 = vsyncpa [#allocation8], 0 }
   0x2   :  { %11 = vsyncpa [#allocation6], 0  ;;  %s325_s12 = smov [#allocation4]  }
   0x3   :  { %s17_s13 = sshll.u32 %s325_s12, 4  ;;  %s18_s13 = int_to_ptr.vmem [resolvable:$true] %s17_s13 }
   0x4   :  { %s267_s14 = scalar_lea.vmem %s18_s13, 224  ;;  %p272_p1 = scmp.lt.s32.totalorder %s18_s13, %s18_s13 }
   0x5   :  { %p268_p0 = scmp.ne.s32.totalorder %s18_s13, %s267_s14  ;;  %p273_p2 = scmp.lt.s32.totalorder %s267_s14, %s267_s14 }
   0x7   :  { %p274_p3 = por %p273_p2, %p272_p1 }
   0x9   :  { %p275_p4 = pnand %p274_p3, %p268_p0 }
   0xb   :  { %278 = shalt.err (!%p275_p4)
}
   0xc   :  { %s326_s15 = smov 32   ;;  %s327_s16 = smov 2  }
   0xd   :  { %23 = dma.hbm_to_vmem [thread:$0]  %s378_s1, 224, %s18_s13, [#allocation5], %s326_s15, %s326_s15, %s327_s16  }
   0xe   :  { %s328_s19 = smov [#allocation7]  }
   0xf   :  { %s29_s20 = sshll.u32 %s328_s19, 4  ;;  %s30_s20 = int_to_ptr.vmem [resolvable:$true] %s29_s20 }
  0x10   :  { %s287_s21 = scalar_lea.vmem %s30_s20, 112  ;;  %s291_s22 = scalar_lea.vmem %s30_s20, 128 }
  0x11   :  { %p288_p5 = scmp.ne.s32.totalorder %s30_s20, %s287_s21  ;;  %p292_p6 = scmp.lt.s32.totalorder %s30_s20, %s30_s20 }
  0x12   :  { %p293_p7 = scmp.lt.s32.totalorder %s291_s22, %s287_s21 }
  0x14   :  { %p294_p8 = por %p293_p7, %p292_p6 }
  0x16   :  { %p295_p9 = pnand %p294_p8, %p288_p5 }
  0x18   :  { %298 = shalt.err (!%p295_p9)
}
  0x19   :  { %s329_s23 = smov 16   ;;  %s330_s24 = smov 1  }
  0x1a   :  { %35 = dma.hbm_to_vmem [thread:$0]  %s379_s2, 112, %s30_s20, [#allocation8], %s329_s23, %s329_s23, %s330_s24  }
  0x1b   :  { %319 = dma.done.wait [#allocation5], 224  }
  0x1c   :  { %320 = vsyncadd [#allocation5], 4294967072 }
  0x1d   :  { %321 = dma.done.wait [#allocation8], 112  }
  0x1e   :  { %322 = vsyncadd [#allocation8], 4294967184  ;;  %v105_v0 = vlaneseq  ;;  %s125_s28 = smul.u32 2654435769, %s377_s0  ;;  %v42_v16 = vld [vmem:[#allocation4] sm:$0x3] }
  0x1f   :  { %v245_v17 = vld [vmem:[#allocation7] ss:$0 sm:$0xff]  ;;  %v43_v20 = vld [vmem:[#allocation4 + $0x2] sm:$0x3]  ;;  %v246_v21 = vld [vmem:[#allocation7 + $0x1] ss:$0 sm:$0xff] }
  0x20   :  { %v106_v1 = vshrl.u32 %v105_v0, 7  ;;  %v108_v2 = vand.u32 127, %v105_v0  ;;  %v134_v4 = vstv %s125_s28  ;;  %v44_v24 = vld [vmem:[#allocation4 + $0x4] sm:$0x3]  ;;  %v247_v25 = vld [vmem:[#allocation7 + $0x2] ss:$0 sm:$0xff]  ;;  %v98_v28 = vadd.f32 %v245_v17, %v42_v16 }
  0x21   :  { %v99_v32 = vadd.f32 %v246_v21, %v43_v20  ;;  %v100_v38 = vadd.f32 %v247_v25, %v44_v24  ;;  %vm219_vm0 = vcmask 254976   ;;  %v45_v48 = vld [vmem:[#allocation4 + $0x6] sm:$0x3]  ;;  %v248_v49 = vld [vmem:[#allocation7 + $0x3] ss:$0 sm:$0xff]  ;;  %s331_s0 = smov [#allocation9]  }
  0x22   :  { %v109_v3 = vmul.u32 32, %v106_v1  ;;  %v205_v45 = vmul.f32 1.1111112, %v98_v28  ;;  %v101_v1 = vadd.f32 %v248_v49, %v45_v48  ;;  %s232_s2 = sshll.u32 %s331_s0, 4  ;;  %s233_s2 = int_to_ptr.vmem [resolvable:$true] %s232_s2 }
  0x23   :  { %v206_v56 = vmul.f32 1.1111112, %v99_v32  ;;  %v48_v32 = vld [vmem:[#allocation4 + $0xc] sm:$0x3]  ;;  %s299_s29 = scalar_lea.vmem %s233_s2, 224  ;;  %p304_p11 = scmp.lt.s32.totalorder %s233_s2, %s233_s2 }
  0x24   :  { %v116_v5 = vadd.s32 %v109_v3, %v108_v2  ;;  %v110_v6 = vadd.s32 64, %v109_v3  ;;  %v111_v7 = vadd.s32 128, %v109_v3  ;;  %v112_v8 = vadd.s32 192, %v109_v3  ;;  %p300_p10 = scmp.ne.s32.totalorder %s233_s2, %s299_s29  ;;  %p305_p12 = scmp.lt.s32.totalorder %s299_s29, %s299_s29 }
  0x25   :  { %v113_v27 = vadd.s32 256, %v109_v3  ;;  %v114_v35 = vadd.s32 320, %v109_v3  ;;  %v115_v43 = vadd.s32 384, %v109_v3 }
  0x26   :  { %v135_v9 = vxor.u32 %v134_v4, %v116_v5  ;;  %v117_v10 = vadd.s32 %v110_v6, %v108_v2  ;;  %v118_v11 = vadd.s32 %v111_v7, %v108_v2  ;;  %v119_v12 = vadd.s32 %v112_v8, %v108_v2  ;;  %p306_p13 = por %p305_p12, %p304_p11 }
  0x27   :  { %v120_v34 = vadd.s32 %v113_v27, %v108_v2  ;;  %v121_v42 = vadd.s32 %v114_v35, %v108_v2  ;;  %v122_v53 = vadd.s32 %v115_v43, %v108_v2  ;;  %v207_v2 = vmul.f32 1.1111112, %v100_v38 }
  0x28   :  { %v142_v13 = vshrl.u32 %v135_v9, 16  ;;  %v136_v14 = vxor.u32 %v134_v4, %v117_v10  ;;  %v137_v15 = vxor.u32 %v134_v4, %v118_v11  ;;  %v138_v18 = vxor.u32 %v134_v4, %v119_v12  ;;  %v46_v11 = vld [vmem:[#allocation4 + $0x8] sm:$0x3]  ;;  %p307_p0 = pnand %p306_p13, %p300_p10 }
  0x29   :  { %v139_v41 = vxor.u32 %v134_v4, %v120_v34  ;;  %v140_v52 = vxor.u32 %v134_v4, %v121_v42  ;;  %v141_v61 = vxor.u32 %v134_v4, %v122_v53 }
  0x2a   :  { %v149_v19 = vxor.u32 %v142_v13, %v135_v9  ;;  %v143_v22 = vshrl.u32 %v136_v14, 16  ;;  %v144_v23 = vshrl.u32 %v137_v15, 16  ;;  %v145_v26 = vshrl.u32 %v138_v18, 16  ;;  %v249_v13 = vld [vmem:[#allocation7 + $0x4] ss:$0 sm:$0xff] }
  0x2b   :  { %v146_v51 = vshrl.u32 %v139_v41, 16  ;;  %v147_v60 = vshrl.u32 %v140_v52, 16  ;;  %v148_v7 = vshrl.u32 %v141_v61, 16  ;;  %v102_v25 = vadd.f32 %v249_v13, %v46_v11 }
  0x2c   :  { %v156_v29 = vmul.u32 2146121005, %v149_v19  ;;  %v150_v30 = vxor.u32 %v143_v22, %v136_v14  ;;  %v151_v31 = vxor.u32 %v144_v23, %v137_v15  ;;  %v152_v33 = vxor.u32 %v145_v26, %v138_v18  ;;  %v47_v22 = vld [vmem:[#allocation4 + $0xa] sm:$0x3]  ;;  %v250_v23 = vld [vmem:[#allocation7 + $0x5] ss:$0 sm:$0xff] }
  0x2d   :  { %v153_v59 = vxor.u32 %v146_v51, %v139_v41  ;;  %v154_v6 = vxor.u32 %v147_v60, %v140_v52  ;;  %v155_v16 = vxor.u32 %v148_v7, %v141_v61  ;;  %v208_v18 = vmul.f32 1.1111112, %v101_v1 }
  0x2e   :  { %v163_v36 = vshrl.u32 %v156_v29, 15  ;;  %v157_v37 = vmul.u32 2146121005, %v150_v30  ;;  %v158_v39 = vmul.u32 2146121005, %v151_v31 }
  0x2f   :  { %v159_v40 = vmul.u32 2146121005, %v152_v33  ;;  %v160_v5 = vmul.u32 2146121005, %v153_v59  ;;  %v251_v33 = vld [vmem:[#allocation7 + $0x6] ss:$0 sm:$0xff] }
  0x30   :  { %v170_v44 = vxor.u32 %v163_v36, %v156_v29  ;;  %v164_v46 = vshrl.u32 %v157_v37, 15  ;;  %v165_v47 = vshrl.u32 %v158_v39, 15  ;;  %v161_v15 = vmul.u32 2146121005, %v154_v6 }
  0x31   :  { %v166_v50 = vshrl.u32 %v159_v40, 15  ;;  %v167_v14 = vshrl.u32 %v160_v5, 15  ;;  %v162_v26 = vmul.u32 2146121005, %v155_v16  ;;  %v103_v36 = vadd.f32 %v250_v23, %v47_v22 }
  0x32   :  { %v177_v54 = vmul.u32 2221713035, %v170_v44  ;;  %v171_v55 = vxor.u32 %v164_v46, %v157_v37  ;;  %v172_v57 = vxor.u32 %v165_v47, %v158_v39  ;;  %v168_v24 = vshrl.u32 %v161_v15, 15 }
  0x33   :  { %v173_v58 = vxor.u32 %v166_v50, %v159_v40  ;;  %v174_v21 = vxor.u32 %v167_v14, %v160_v5  ;;  %v169_v34 = vshrl.u32 %v162_v26, 15  ;;  %v209_v37 = vmul.f32 1.1111112, %v102_v25 }
  0x34   :  { %v184_v62 = vshrl.u32 %v177_v54, 16  ;;  %v178_v63 = vmul.u32 2221713035, %v171_v55  ;;  %v179_v0 = vmul.u32 2221713035, %v172_v57  ;;  %v175_v31 = vxor.u32 %v168_v24, %v161_v15 }
  0x35   :  { %v180_v3 = vmul.u32 2221713035, %v173_v58  ;;  %v181_v29 = vmul.u32 2221713035, %v174_v21  ;;  %v176_v39 = vxor.u32 %v169_v34, %v162_v26  ;;  %v104_v41 = vadd.f32 %v251_v33, %v48_v32 }
  0x36   :  { %v191_v8 = vxor.u32 %v184_v62, %v177_v54  ;;  %v185_v9 = vshrl.u32 %v178_v63, 16  ;;  %v186_v10 = vshrl.u32 %v179_v0, 16  ;;  %v182_v38 = vmul.u32 2221713035, %v175_v31 }
  0x37   :  { %v187_v12 = vshrl.u32 %v180_v3, 16  ;;  %v188_v35 = vshrl.u32 %v181_v29, 16  ;;  %v183_v43 = vmul.u32 2221713035, %v176_v39  ;;  %v210_v44 = vmul.f32 1.1111112, %v103_v36 }
  0x38   :  { %vm198_vm1 = vcmp.lt.u32.totalorder %v191_v8, 3865470566  ;;  %v192_v4 = vxor.u32 %v185_v9, %v178_v63  ;;  %v193_v17 = vxor.u32 %v186_v10, %v179_v0  ;;  %v189_v42 = vshrl.u32 %v182_v38, 16 }
  0x39   :  { %v212_v19 = vsel %vm198_vm1, %v205_v45, 0.0  ;;  %v194_v20 = vxor.u32 %v187_v12, %v180_v3  ;;  %v195_v40 = vxor.u32 %v188_v35, %v181_v29  ;;  %v190_v47 = vshrl.u32 %v183_v43, 16 }
  0x3a   :  { %220 = vst.msk [vmem:[#allocation9] sm:$0x3] %vm219_vm0, %v212_v19  ;;  %vm199_vm2 = vcmp.lt.u32.totalorder %v192_v4, 3865470566  ;;  %vm200_vm3 = vcmp.lt.u32.totalorder %v193_v17, 3865470566  ;;  %v196_v46 = vxor.u32 %v189_v42, %v182_v38 }
  0x3b   :  { %v213_v27 = vsel %vm199_vm2, %v206_v56, 0.0  ;;  %v214_v28 = vsel %vm200_vm3, %v207_v2, 0.0  ;;  %vm201_vm4 = vcmp.lt.u32.totalorder %v194_v20, 3865470566  ;;  %vm202_vm5 = vcmp.lt.u32.totalorder %v195_v40, 3865470566 }
  0x3c   :  { %221 = vst.msk [vmem:[#allocation9 + $0x2] sm:$0x3] %vm219_vm0, %v213_v27  ;;  %222 = vst.msk [vmem:[#allocation9 + $0x4] sm:$0x3] %vm219_vm0, %v214_v28  ;;  %v215_v30 = vsel %vm201_vm4, %v208_v18, 0.0  ;;  %v216_v45 = vsel %vm202_vm5, %v209_v37, 0.0  ;;  %v197_v49 = vxor.u32 %v190_v47, %v183_v43 }
  0x3d   :  { %223 = vst.msk [vmem:[#allocation9 + $0x6] sm:$0x3] %vm219_vm0, %v215_v30  ;;  %224 = vst.msk [vmem:[#allocation9 + $0x8] sm:$0x3] %vm219_vm0, %v216_v45  ;;  %v211_v48 = vmul.f32 1.1111112, %v104_v41 }
  0x3e   :  { %vm203_vm6 = vcmp.lt.u32.totalorder %v196_v46, 3865470566  ;;  %vm204_vm7 = vcmp.lt.u32.totalorder %v197_v49, 3865470566 }
  0x3f   :  { %v217_v50 = vsel %vm203_vm6, %v210_v44, 0.0  ;;  %v218_v51 = vsel %vm204_vm7, %v211_v48, 0.0 }
  0x40   :  { %225 = vst.msk [vmem:[#allocation9 + $0xa] sm:$0x3] %vm219_vm0, %v217_v50  ;;  %226 = vst.msk [vmem:[#allocation9 + $0xc] sm:$0x3] %vm219_vm0, %v218_v51 }
  0x41   :  { %310 = shalt.err (!%p307_p0)
}
  0x42   :  { %238 = dma.vmem_to_hbm [thread:$0]  %s233_s2, 224, %s380_s3, [#allocation6], %s326_s15, %s326_s15, %s327_s16  }
  0x43   :  { %323 = dma.done.wait [#allocation6], 224  }
  0x44   :  { %324 = vsyncadd [#allocation6], 4294967072 }
  0x45   :  { %242 = vsyncpa [#allocation5], 1 }
  0x46   :  { %243 = vsyncpa [#allocation8], 1 }
  0x47   :  { %244 = vsyncpa [#allocation6], 1 }

</bundles_post_ra>
